<compile_context>
chip_gen: v7x
topology: tpu7x:2x2x1
jax: 0.10.0
libtpu: 0.0.40
codegen_flags: <defaults>
</compile_context>

<pallas_src>
import jax
import jax.numpy as jnp
from jax.experimental import pallas as pl
from jax.experimental.pallas import tpu as pltpu


def _round_up(v, m):
    return (v + m - 1) // m * m


def _choose_tile(n_pad, cap, mult):
    """Largest multiple of `mult` that divides n_pad and is <= cap."""
    best = mult
    t = mult
    lim = min(cap, n_pad)
    while t <= lim:
        if n_pad % t == 0:
            best = t
        t += mult
    return best


def _sage_conv_kernel(a_ref, xwl_ref, xwr_ref, dinv_ref, o_ref, acc_ref):
    """Fused SAGEConv layer + ReLU, tiled over (output rows, reduction k).

    a_ref   : [TM, TK] int8  adjacency tile of edge counts (A[i,j] = #edges j->i)
    xwl_ref : [TK, Hp] bf16  (x @ lin_l.weight^T) slab for this reduction step
    xwr_ref : [TM, Hp] f32   (x @ lin_r.weight^T + lin_l.bias) for this row tile
    dinv_ref: [TM, 1]  f32   1 / max(in_degree, 1)
    o_ref   : [TM, Hp] f32   output tile (Hp = 128, lane dense)
    acc_ref : [TM, Hp] f32   VMEM accumulator for the neighbor aggregation
    """
    k = pl.program_id(1)

    @pl.when(k == 0)
    def _():
        acc_ref[...] = jnp.zeros_like(acc_ref)

    # 1-byte adjacency stream; dequantize on the VPU (int8 -> f32 -> bf16,
    # values are small exact integers) and do a lane-dense bf16 MXU matmul
    # with f32 accumulation.  This is the dominant, HBM-bound step.
    a_bf = a_ref[...].astype(jnp.float32).astype(jnp.bfloat16)
    acc_ref[...] += jnp.dot(a_bf, xwl_ref[...],
                            preferred_element_type=jnp.float32)

    @pl.when(k == pl.num_programs(1) - 1)
    def _():
        # mean aggregation = neighbor sum * 1/deg (exact f32), plus the root
        # linear path (bias already folded in), then ReLU.
        out = acc_ref[...] * dinv_ref[...] + xwr_ref[...]
        # dropout(p=0.2) is identity in eval mode; act_func = relu applies
        # because layer index 0 < n_conv_layers - 1 (n_conv_layers = 2).
        o_ref[...] = jnp.maximum(out, 0.0)


def gnn_model_forward(x, edge_index, params):
    """Equivalent of GNN_model.forward (SAGEConv, n_conv_layers=2, relu, eval)."""
    n, c = x.shape
    h = params["wl_t"].shape[1]
    h_pad = _round_up(h, 128)                    # lane-dense output width

    # Pad nodes only to a multiple of 128 (not to max(tm, tk)): adjacency
    # traffic scales with n_pad^2.
    n_pad = _round_up(n, 128)

    # Reduction tile: multiple of 128 dividing n_pad, up to 2048.
    tk = _choose_tile(n_pad, cap=2048, mult=128)
    # Row tile: multiple of 8 dividing n_pad, capped at 512 and at n_pad//2
    # (when possible) so the "parallel" row axis has >= 2 tiles for the two
    # v7x TensorCores.
    tm_cap = min(512, n_pad // 2) if n_pad >= 256 else n_pad
    tm = _choose_tile(n_pad, cap=tm_cap, mult=8)

    grid = (n_pad // tm, n_pad // tk)

    # ---- Wrapper-side prework (all cheap relative to the O(N^2) kernel) ----
    # Skinny linear layers reassociated out of the kernel.
    xwl = (x @ params["wl_t"]).astype(jnp.bfloat16)                 # (n, h)
    xwr_b = x @ params["wr_t"] + params["bias"][None, :]            # (n, h) f32

    xwl_p = jnp.zeros((n_pad, h_pad), jnp.bfloat16).at[:n, :h].set(xwl)
    xwr_p = jnp.zeros((n_pad, h_pad), jnp.float32).at[:n, :h].set(xwr_b)

    src = edge_index[0]
    dst = edge_index[1]
    # In-degree (counting duplicate edges, like PyG mean aggregation): O(E).
    deg = jnp.zeros((n_pad,), jnp.float32).at[dst].add(1.0)
    dinv = (1.0 / jnp.maximum(deg, 1.0)).reshape(n_pad, 1)
    # Edge-count adjacency, built directly in the 1-byte streaming dtype.
    # TODO(synk): int8 saturates above 127 parallel edges between one pair.
    a_cnt = jnp.zeros((n_pad, n_pad), jnp.int8).at[dst, src].add(1)

    cost = pl.CostEstimate(
        flops=2 * n_pad * n_pad * h_pad,
        transcendentals=0,
        bytes_accessed=(n_pad * n_pad * 1                # adjacency (int8)
                        + grid[0] * n_pad * h_pad * 2    # xWl re-read per row tile
                        + n_pad * h_pad * 4              # xWr + bias
                        + n_pad * 4                      # 1/deg
                        + n_pad * h_pad * 4),            # output
    )

    out = pl.pallas_call(
        _sage_conv_kernel,
        out_shape=jax.ShapeDtypeStruct((n_pad, h_pad), jnp.float32),
        grid_spec=pltpu.PrefetchScalarGridSpec(
            num_scalar_prefetch=0,
            grid=grid,
            in_specs=[
                pl.BlockSpec((tm, tk), lambda i, k: (i, k)),      # A counts
                pl.BlockSpec((tk, h_pad), lambda i, k: (k, 0)),   # x @ Wl^T
                pl.BlockSpec((tm, h_pad), lambda i, k: (i, 0)),   # x @ Wr^T + b
                pl.BlockSpec((tm, 1), lambda i, k: (i, 0)),       # 1/deg
            ],
            out_specs=pl.BlockSpec((tm, h_pad), lambda i, k: (i, 0)),
            scratch_shapes=[pltpu.VMEM((tm, h_pad), jnp.float32)],
        ),
        compiler_params=pltpu.CompilerParams(
            dimension_semantics=("parallel", "arbitrary"),
            vmem_limit_bytes=32 * 1024 * 1024,
        ),
        cost_estimate=cost,
    )(a_cnt, xwl_p, xwr_p, dinv)

    return out[:n, :h]


def init_params(key, in_channels, hidden_channels):
    """Deterministic synthetic SAGEConv parameters (lin_l with bias, lin_r no bias)."""
    k1, k2, k3 = jax.random.split(key, 3)
    scale = 1.0 / jnp.sqrt(jnp.float32(in_channels))
    wl = jax.random.uniform(k1, (hidden_channels, in_channels), jnp.float32,
                            -scale, scale)
    wr = jax.random.uniform(k2, (hidden_channels, in_channels), jnp.float32,
                            -scale, scale)
    b = jax.random.uniform(k3, (hidden_channels,), jnp.float32, -scale, scale)
    return {"wl_t": wl.T, "wr_t": wr.T, "bias": b}


if __name__ == "__main__":
    # Small shapes consistent with the module: N nodes, in_channels=8,
    # hidden=32.  N=300 exercises padding (-> 384) and a (2, 1) tiled grid
    # (tm=192, tk=384), i.e. two row tiles on the "parallel" axis.
    N, C, H, E = 300, 8, 32, 1200

    key = jax.random.PRNGKey(0)
    kx, ke, kp = jax.random.split(key, 3)

    x = jax.random.normal(kx, (N, C), jnp.float32)
    edge_index = jax.random.randint(ke, (2, E), 0, N, jnp.int32)
    params = init_params(kp, C, H)

    out = jax.block_until_ready(gnn_model_forward(x, edge_index, params))
    assert out.shape == (N, H)

    # Pure-JAX reference of the same math; x @ Wl^T is rounded to bf16 exactly
    # as the kernel's streamed operand (adjacency counts and 1/deg are exact
    # in both paths, so the comparison is tight).
    a_f = jnp.zeros((N, N), jnp.float32).at[edge_index[1], edge_index[0]].add(1.0)
    deg = jnp.maximum(jnp.sum(a_f, axis=1, keepdims=True), 1.0)
    xwl_ref = (x @ params["wl_t"]).astype(jnp.bfloat16).astype(jnp.float32)
    ref = jnp.maximum(
        (a_f @ xwl_ref) / deg + x @ params["wr_t"] + params["bias"][None, :],
        0.0,
    )
    err = float(jnp.max(jnp.abs(out - ref)))
    assert jnp.allclose(out, ref, atol=1e-2, rtol=1e-2), err

    print("KERNEL_OK")
</pallas_src>

<mosaic_0001>
module attributes {stable_mosaic.version = 11 : i64} {
  func.func @_sage_conv_kernel(%arg0: i32, %arg1: i32, %arg2: memref<192x384xi8, #tpu.memory_space<vmem>>, %arg3: memref<384x128xbf16, #tpu.memory_space<vmem>>, %arg4: memref<192x128xf32, #tpu.memory_space<vmem>>, %arg5: memref<192x1xf32, #tpu.memory_space<vmem>>, %arg6: memref<192x128xf32, #tpu.memory_space<vmem>>, %arg7: memref<192x128xf32, #tpu.memory_space<vmem>>) attributes {dimension_semantics = [#tpu.dimension_semantics<parallel>, #tpu.dimension_semantics<arbitrary>], iteration_bounds = array<i64: 2, 1>, scalar_prefetch = 0 : i64, scratch_operands = 1 : i64, tpu.core_type = #tpu.core_type<tc>, window_params = [{transform_indices = @transform_0, window_bounds = array<i64: 192, 384>}, {transform_indices = @transform_1, window_bounds = array<i64: 384, 128>}, {transform_indices = @transform_2, window_bounds = array<i64: 192, 128>}, {transform_indices = @transform_3, window_bounds = array<i64: 192, 1>}, {transform_indices = @transform_4, window_bounds = array<i64: 192, 128>}]} {
    %c0_i32 = arith.constant 0 : i32
    %0 = arith.cmpi eq, %arg1, %c0_i32 : i32
    %1 = arith.extui %0 : i1 to i32
    %c0_i32_0 = arith.constant 0 : i32
    %2 = arith.cmpi ne, %1, %c0_i32_0 : i32
    scf.if %2 {
      %cst_10 = arith.constant 0.000000e+00 : f32
      %14 = vector.broadcast %cst_10 : f32 to vector<192x128xf32>
      %c0_11 = arith.constant 0 : index
      %c0_12 = arith.constant 0 : index
      %15 = vector.load %arg7[%c0_11, %c0_12] : memref<192x128xf32, #tpu.memory_space<vmem>>, vector<192x128xf32>
      tpu.vector_store %arg7[%c0_11, %c0_12], %14 {strides = array<i32>} : memref<192x128xf32, #tpu.memory_space<vmem>>, vector<192x128xf32>,
    } else {
    }
    %c0 = arith.constant 0 : index
    %c0_1 = arith.constant 0 : index
    %3 = vector.load %arg2[%c0, %c0_1] : memref<192x384xi8, #tpu.memory_space<vmem>>, vector<192x384xi8>
    %4 = arith.sitofp %3 : vector<192x384xi8> to vector<192x384xf32>
    %5 = arith.truncf %4 : vector<192x384xf32> to vector<192x384xbf16>
    %c0_2 = arith.constant 0 : index
    %c0_3 = arith.constant 0 : index
    %6 = vector.load %arg7[%c0_2, %c0_3] : memref<192x128xf32, #tpu.memory_space<vmem>>, vector<192x128xf32>
    %c0_4 = arith.constant 0 : index
    %c0_5 = arith.constant 0 : index
    %7 = vector.load %arg3[%c0_4, %c0_5] : memref<384x128xbf16, #tpu.memory_space<vmem>>, vector<384x128xbf16>
    %cst = arith.constant dense<0.000000e+00> : vector<192x128xf32>
    %8 = tpu.matmul %5, %7, %cst {dimension_numbers = #tpu.dot_dimension_numbers<[1], [0], [0], [1], [0, 0, 1, 1], [], []>} : vector<192x384xbf16>, vector<384x128xbf16>, vector<192x128xf32> -> vector<192x128xf32>
    %9 = arith.addf %6, %8 : vector<192x128xf32>
    %c0_6 = arith.constant 0 : index
    %c0_7 = arith.constant 0 : index
    %10 = vector.load %arg7[%c0_6, %c0_7] : memref<192x128xf32, #tpu.memory_space<vmem>>, vector<192x128xf32>
    tpu.vector_store %arg7[%c0_6, %c0_7], %9 {strides = array<i32>} : memref<192x128xf32, #tpu.memory_space<vmem>>, vector<192x128xf32>,
    %c0_i32_8 = arith.constant 0 : i32
    %11 = arith.cmpi eq, %arg1, %c0_i32_8 : i32
    %12 = arith.extui %11 : i1 to i32
    %c0_i32_9 = arith.constant 0 : i32
    %13 = arith.cmpi ne, %12, %c0_i32_9 : i32
    scf.if %13 {
      %c0_10 = arith.constant 0 : index
      %c0_11 = arith.constant 0 : index
      %14 = vector.load %arg7[%c0_10, %c0_11] : memref<192x128xf32, #tpu.memory_space<vmem>>, vector<192x128xf32>
      %c0_12 = arith.constant 0 : index
      %c0_13 = arith.constant 0 : index
      %15 = vector.load %arg5[%c0_12, %c0_13] : memref<192x1xf32, #tpu.memory_space<vmem>>, vector<192x1xf32>
      %16 = vector.broadcast %15 : vector<192x1xf32> to vector<192x128xf32>
      %17 = arith.mulf %14, %16 : vector<192x128xf32>
      %c0_14 = arith.constant 0 : index
      %c0_15 = arith.constant 0 : index
      %18 = vector.load %arg4[%c0_14, %c0_15] : memref<192x128xf32, #tpu.memory_space<vmem>>, vector<192x128xf32>
      %19 = arith.addf %17, %18 : vector<192x128xf32>
      %cst_16 = arith.constant 0.000000e+00 : f32
      %20 = vector.broadcast %cst_16 : f32 to vector<192x128xf32>
      %21 = arith.maximumf %19, %20 : vector<192x128xf32>
      %c0_17 = arith.constant 0 : index
      %c0_18 = arith.constant 0 : index
      %22 = vector.load %arg6[%c0_17, %c0_18] : memref<192x128xf32, #tpu.memory_space<vmem>>, vector<192x128xf32>
      tpu.vector_store %arg6[%c0_17, %c0_18], %21 {strides = array<i32>} : memref<192x128xf32, #tpu.memory_space<vmem>>, vector<192x128xf32>,
    } else {
    }
    return
  }
  func.func @transform_0(%arg0: i32, %arg1: i32) -> (i32, i32) {
    %c0_i32 = arith.constant 0 : i32
    return %arg0, %arg1 : i32, i32
  }
  func.func @transform_1(%arg0: i32, %arg1: i32) -> (i32, i32) {
    %c0_i32 = arith.constant 0 : i32
    %c0_i32_0 = arith.constant 0 : i32
    return %arg1, %c0_i32 : i32, i32
  }
  func.func @transform_2(%arg0: i32, %arg1: i32) -> (i32, i32) {
    %c0_i32 = arith.constant 0 : i32
    %c0_i32_0 = arith.constant 0 : i32
    return %arg0, %c0_i32 : i32, i32
  }
  func.func @transform_3(%arg0: i32, %arg1: i32) -> (i32, i32) {
    %c0_i32 = arith.constant 0 : i32
    %c0_i32_0 = arith.constant 0 : i32
    return %arg0, %c0_i32 : i32, i32
  }
  func.func @transform_4(%arg0: i32, %arg1: i32) -> (i32, i32) {
    %c0_i32 = arith.constant 0 : i32
    %c0_i32_0 = arith.constant 0 : i32
    return %arg0, %c0_i32 : i32, i32
  }
}

</mosaic_0001>

<bundles_post_ra>
// kernel: tpu_custom_call.1
= control target key start
LH: loop header
LB: loop body
LE: loop exit
PB: predicated region body
PF: predicated region fallthrough
CT: control target
= control target key end

     0   :  { %9 = vsyncpa [#allocation4], 0  ;;  %s2181_s0 = inlined_call_operand.hbm [shape: s8[384,384], index: 0, kind: input, shape index: {}]   ;;  %s2182_s1 = inlined_call_operand.hbm [shape: bf16[384,128], index: 1, kind: input, shape index: {}]   ;;  %s2183_s2 = inlined_call_operand.vmem [shape: f32[384,128], index: 2, kind: input, shape index: {}]   ;;  %s2184_s3 = inlined_call_operand.vmem [shape: f32[384,1], index: 3, kind: input, shape index: {}]   ;;  %s2185_s4 = inlined_call_operand.hbm [shape: f32[384,128], index: 4, kind: output, shape index: {}]  }
   0x1   :  { %11 = vsyncpa [#allocation4 + $0x1], 0 }
   0x2   :  { %12 = vsyncpa [#allocation7], 0 }
   0x3   :  { %13 = vsyncpa [#allocation5], 0 }
   0x4   :  { %15 = vsyncpa [#allocation5 + $0x1], 0  ;;  %s1812_s15 = smov 0   ;;  %s1814_s16 = smov 0  }
   0x5   :  { %s1816_s17 = smov 0   ;;  %s1818_s18 = smov 0  }
   0x6   :  { %s1820_s19 = smov 0   ;;  %s1822_s20 = smov 0  }
   0x7 LB: > { %s1334_s21 = sadd.s32 4294967295, %s1775_s20   ;;  %s1335_s22 = sadd.s32 4294967294, %s1775_s20   ;;  %s1775_s20 = sphi %s1822_s20, %s21_s20   ;;  %s1771_s19 = sphi %s1820_s19, %s2208_s19   ;;  %s1767_s18 = sphi %s1818_s18, %s2207_s18   ;;  %s1763_s17 = sphi %s1816_s17, %s2206_s17   ;;  %s1759_s16 = sphi %s1814_s16, %s2205_s16   ;;  %s1755_s15 = sphi %s1812_s15, %s2204_s15  }
   0x8   : > { %p55_p0 = scmp.ne.s32.totalorder %s1759_s16, %s1755_s15  ;;  %p1846_p1 = scmp.eq.s32.totalorder %s1334_s21, 0 }
   0x9   : > { %p1850_p2 = scmp.eq.s32.totalorder %s1334_s21, 1  ;;  %p163_p3 = scmp.eq.s32.totalorder %s1335_s22, 1 }
   0xa   : > { %s2190_s23 = scalar_select %p1846_p1, 1, 0 }
   0xb   : > { %s2191_s24 = scalar_select %p1850_p2, 1, 0 }
   0xc   : > { %p1856_p4 = por %p1846_p1, %p55_p0  ;;  %p1336_p5 = scmp.ge.s32.totalorder %s1775_s20, 1 }
   0xd   : > { %p1861_p6 = por %p163_p3, %p55_p0  ;;  %p170_p7 = scmp.lt.s32.totalorder %s1775_s20, 3 }
   0xe   : > { %s2192_s25 = scalar_select %p1856_p4, 1, 0 }
   0xf   : > { %s2193_s26 = scalar_select %p1861_p6, 1, 0 }
  0x10   : > { %p1866_p8 = pnand %p1336_p5, %p170_p7  ;;  %s1777_s28 = smov [#allocation6]  }
  0x11   : > { %s185_s29 = sshll.u32 %s1777_s28, 4  ;;  %s33_s5 = sadd.s32 1, %s1771_s19  ;;  %s186_s29 = int_to_ptr.vmem [resolvable:$true] %s185_s29 }
  0x12   : > { %s2194_s27 = scalar_select %p1866_p8, 1, 0 }
  0x13   : > { %p1532_p9 = pneg %p1866_p8  ;;  %s1631_s8 = scalar_lea.hbm %s2182_s1, 3072 }
  0x14   : > { %p1632_p12 = scmp.ne.s32.totalorder %s2182_s1, %s1631_s8  ;;  %p1638_p5 = scmp.lt.u32.totalorder %s1631_s8, %s2182_s1 }
  0x15   : > { %p1875_p11 = pnand %p1532_p9, %p1846_p1 }
  0x17   : > { %p1633_p13 = pneg %p1875_p11 }
  0x19   : > { %p1634_p0 = pnand %p1633_p13, %p1632_p12 }
  0x1b   : > { %p1635_p3 = pneg %p1634_p0 }
  0x1d   : > { %p1640_p7 = pnand %p1638_p5, %p1635_p3 }
  0x1f   : > { %1643 = shalt.err (!%p1640_p7)
}
  0x20   : > { %s1644_s13 = scalar_lea.vmem %s186_s29, 3072  ;;  %p1652_p1 = scmp.lt.s32.totalorder %s186_s29, %s186_s29 }
  0x21   : > { %p1645_p9 = scmp.ne.s32.totalorder %s186_s29, %s1644_s13  ;;  %p1653_p4 = scmp.lt.s32.totalorder %s1644_s13, %s1644_s13 }
  0x23   : > { %p1647_p10 = pnand %p1645_p9, %p1633_p13  ;;  %p1654_p8 = por %p1653_p4, %p1652_p1 }
  0x25   : > { %p1648_p6 = pneg %p1647_p10 }
  0x27   : > { %p1655_p2 = pnand %p1654_p8, %p1648_p6 }
  0x29   : > { %1658 = shalt.err (!%p1655_p2)
}
  0x2a   : > { %s1778_s14 = smov 64   ;;  %s1779_s21 = smov 4  }
  0x2b   : > { %1535 = dma.hbm_to_vmem [thread:$0]  (!%p1875_p11), %s2182_s1, 3072, %s186_s29, [#allocation7], %s1778_s14, %s1778_s14, %s1779_s21  }
  0x2c   : > { %p35_p1 = scmp.ge.s32.totalorder %s33_s5, 2  ;;  %s42_s6 = sadd.s32 1, %s1763_s17 }
  0x2d   : > { %p49_p2 = scmp.ne.s32.totalorder %s1763_s17, %s1759_s16  ;;  %p50_p4 = scmp.eq.s32.totalorder %s1775_s20, 0 }
  0x2e   : > { %s2210_s5 = smov (%p35_p1, %s33_s5), 0  ;;  %p2196_p8 = scmp.ne.s32.totalorder %s2191_s24, 0 }
  0x2f   : > { %p51_p6 = por %p50_p4, %p49_p2  ;;  %s37_s8 = ssub.s32 %s1771_s19, %s2210_s5 }
  0x30   : > { %p1904_p10 = por %p2196_p8, %p49_p2  ;;  %p1545_p12 = scmp.lt.s32.totalorder %s1775_s20, 2 }
  0x31   : > { %p40_p13 = scmp.eq.s32.totalorder %s37_s8, 0  ;;  %s199_s30 = sand.u32 1, %s1763_s17  }
  0x32   : > { %s1520_s9 = smul.u32 144, %s199_s30  ;;  %p1918_p11 = pnand %p1545_p12, %p51_p6 }
  0x33   : > { %s1913_s10 = scalar_select %p40_p13, %s1763_s17, %s42_s6  }
  0x34   : > { %s1546_s29 = smul.u32 2304, %s1771_s19  ;;  %s203_s11 = scalar_lea.vmem [#allocation3], %s1520_s9 }
  0x35   : > { %s213_s12 = sshll.u32 %s203_s11, 4  ;;  %s1927_s22 = scalar_lea.sflag [#allocation4], %s199_s30  ;;  %s1916_s12 = int_to_ptr.vmem [resolvable:$true] %s213_s12 }
  0x36   : > { %s1925_s21 = scalar_lea.hbm %s2181_s0, %s1546_s29  ;;  %p1661_p3 = pneg %p1918_p11 }
  0x37   : > { %s1659_s28 = scalar_lea.hbm %s1925_s21, 2304  ;;  %s1664_s9 = scalar_lea.hbm %s2181_s0, 4608 }
  0x38   : > { %p1660_p0 = scmp.ne.s32.totalorder %s1925_s21, %s1659_s28  ;;  %p1665_p9 = scmp.lt.u32.totalorder %s1925_s21, %s2181_s0 }
  0x39   : > { %p1666_p1 = scmp.lt.u32.totalorder %s1664_s9, %s1659_s28  ;;  %p1668_p4 = scmp.lt.u32.totalorder %s1659_s28, %s1925_s21 }
  0x3a   : > { %p1662_p5 = pnand %p1661_p3, %p1660_p0 }
  0x3b   : > { %p1667_p2 = por %p1666_p1, %p1665_p9 }
  0x3c   : > { %p1663_p7 = pneg %p1662_p5 }
  0x3d   : > { %p1669_p6 = por %p1668_p4, %p1667_p2 }
  0x3f   : > { %p1670_p8 = pnand %p1669_p6, %p1663_p7 }
  0x41   : > { %1673 = shalt.err (!%p1670_p8)
}
  0x42   : > { %s1674_s30 = scalar_lea.vmem %s1916_s12, 2304  ;;  %s1780_s24 = smov [#allocation3]  }
  0x43   : > { %p1675_p12 = scmp.ne.s32.totalorder %s1916_s12, %s1674_s30  ;;  %s1679_s14 = sshll.u32 %s1780_s24, 4  ;;  %s1680_s14 = int_to_ptr.vmem [resolvable:$false] %s1679_s14 }
  0x44   : > { %s1681_s6 = scalar_lea.vmem %s1680_s14, 4608  ;;  %p1682_p5 = scmp.lt.s32.totalorder %s1916_s12, %s1680_s14 }
  0x45   : > { %p1677_p13 = pnand %p1675_p12, %p1661_p3  ;;  %p1683_p9 = scmp.lt.s32.totalorder %s1681_s6, %s1674_s30 }
  0x47   : > { %p1678_p0 = pneg %p1677_p13  ;;  %p1684_p1 = por %p1683_p9, %p1682_p5 }
  0x49   : > { %p1685_p2 = pnand %p1684_p1, %p1678_p0 }
  0x4b   : > { %1688 = shalt.err (!%p1685_p2)
}
  0x4c   : > { %s1781_s28 = smov 384   ;;  %s1782_s8 = smov 24  }
  0x4d   : > { %1539 = dma.hbm_to_vmem [thread:$0]  (!%p1918_p11), %s1925_s21, 2304, %s1916_s12, %s1927_s22, %s1781_s28, %s1781_s28, %s1782_s8  }
  0x4e   : > { %p2199_p3 = scmp.ne.s32.totalorder %s2194_s27, 0 }
  0x4f   : > { %s1958_s9 = sand.u32 (!%p2199_p3), 1, %s1759_s16   ;;  %p2200_p7 = scmp.ne.s32.totalorder (!%p2199_p3), %s2192_s25, 0 }
  0x50   : > { %243 = sbr.rel (%p2199_p3) target bundleno = 453 (0x1c5), region = 36  ;;  %s246_s11 = scalar_lea.sflag (!%p2199_p3), [#allocation4], %s1958_s9 }
  0x51   : > { %s1522_s29 = smul.u32 (!%p2199_p3), 144, %s1958_s9 }
  0x53   : > { %s1962_s30 = scalar_lea.vmem (!%p2199_p3), [#allocation3], %s1522_s29 }
  0x57   : > { %1742 = dma.done.wait (%p2200_p7), %s246_s11, 2304  }
  0x58   : > { %1744 = vsyncadd (%p2200_p7), %s246_s11, 4294964992  ;;  %p2201_p11 = scmp.ne.s32.totalorder %s2190_s23, 0 }
  0x5a   : > { %1746 = dma.done.wait (%p2201_p11), [#allocation7], 3072  }
  0x5b   : > { %1748 = vsyncadd (%p2201_p11), [#allocation7], 4294964224  ;;  %v1783_v0 = vmov 0   ;;  %v1607_v1 = vld [vmem:[#allocation6 + $0x40] sm:$0xff]   ;;  %v1610_v4 = vld [vmem:[#allocation6 + $0x48] sm:$0xff]   ;;  %s291_s23 = smul.u32 24, %s1767_s18 }
  0x5c   : > { %1605 = vset.pattern.permute.xlu0 %v1783_v0  ;;  %1606 = vset.pattern.permute.xlu1 %v1783_v0  ;;  %v1608_v2 = vld [vmem:[#allocation6] sm:$0xff]   ;;  %v1611_v5 = vld [vmem:[#allocation6 + $0x8] sm:$0xff]   ;;  %v1613_v7 = vld [vmem:[#allocation6 + $0x50] sm:$0xff]   ;;  %s1523_s14 = smul.u32 192, %s1958_s9 }
  0x5d   : > { %1372 = vmatprep.subr.bf16.mxu0 %v1607_v1  ;;  %v1609_v3 = vld [vmem:[#allocation6 + $0x80] sm:$0xff]   ;;  %v1612_v6 = vld [vmem:[#allocation6 + $0x88] sm:$0xff]   ;;  %v1614_v8 = vld [vmem:[#allocation6 + $0x10] sm:$0xff]   ;;  %p292_p4 = scmp.lt.s32.totalorder %s291_s23, 47  ;;  %s1371_s28 = smul.u32 3072, %s1767_s18 }
  0x5e   : > { %1373 = vmatpush3.bf16.msra.mxu0 %v1608_v2  ;;  %1480 = vmatprep.subr.bf16.mxu1 %v1609_v3  ;;  %v1615_v9 = vld [vmem:[#allocation6 + $0x90] sm:$0xff]   ;;  %v1616_v10 = vld [vmem:[#allocation6 + $0x58] sm:$0xff]   ;;  %v1619_v13 = vld [vmem:[#allocation6 + $0x60] sm:$0xff]   ;;  %s2035_s6 = scalar_lea.vmem [#allocation8], %s1523_s14 }
  0x5f   : > { %1481 = vmatpush3.bf16.msra.mxu1 %v1609_v3  ;;  %1374 = vmatprep.subr.bf16.mxu0 %v1610_v4  ;;  %v1617_v11 = vld [vmem:[#allocation6 + $0x18] sm:$0xff]   ;;  %v1621_v14 = vld [vmem:[#allocation6 + $0xa0] sm:$0xff]   ;;  %v1622_v16 = vld [vmem:[#allocation6 + $0x68] sm:$0xff]   ;;  %s2212_s23 = smov (!%p292_p4, %s291_s23), 47  ;;  %s1214_s8 = sshll.u32 %s2035_s6, 4  ;;  %s2130_s8 = int_to_ptr.vmem [resolvable:$true] %s1214_s8 }
  0x60   : > { %1482 = vmatprep.subr.bf16.mxu1 %v1612_v6  ;;  %v1618_v12 = vld [vmem:[#allocation6 + $0x98] sm:$0xff]   ;;  %v1620_v15 = vld [vmem:[#allocation6 + $0x20] sm:$0xff]   ;;  %v1624_v17 = vld [vmem:[#allocation6 + $0xa8] sm:$0xff]   ;;  %s1342_s25 = sshll.u32 %s2212_s23, 3  ;;  %s1201_s23 = scalar_lea.sflag [#allocation5], %s1958_s9 }
  0x61   : > { %v1623_v18 = vld [vmem:[#allocation6 + $0x28] sm:$0xff]   ;;  %v1625_v19 = vld [vmem:[#allocation6 + $0x70] sm:$0xff]   ;;  %v1628_v22 = vld [vmem:[#allocation6 + $0x78] sm:$0xff]   ;;  %s1984_s13 = scalar_lea.vmem %s2184_s3, %s1342_s25  ;;  %s2030_s24 = scalar_lea.vmem %s2183_s2, %s1342_s25 }
  0x62   : > { %1375 = vmatpush3.bf16.msra.mxu0 %v1611_v5  ;;  %v1627_v20 = vld [vmem:[#allocation6 + $0xb0] sm:$0xff]   ;;  %v334_v23 = vld [vmem:[%s1962_s30 + $0x8] sm:$0xff]  ;;  %v936_v32 = vld [vmem:[%s1984_s13] sm:$0xff]  ;;  %s1689_s18 = scalar_lea.vmem %s2130_s8, 3072  ;;  %s1784_s25 = smov [#allocation8]  }
  0x63   : > { %1376 = vmatprep.subr.bf16.mxu0 %v1613_v7  ;;  %1483 = vmatpush3.bf16.msra.mxu1 %v1612_v6  ;;  %v1626_v21 = vld [vmem:[#allocation6 + $0x30] sm:$0xff]   ;;  %v352_v25 = vunpack.c.l.s8.bf16 %v334_v23  ;;  %v1630_v27 = vld [vmem:[#allocation6 + $0xb8] sm:$0xff]   ;;  %v355_v34 = vunpack.c.h.s8.bf16 %v334_v23  ;;  %v937_v36 = vld [vmem:[%s1984_s13 + $0x8] sm:$0xff]  ;;  %p1690_p6 = scmp.ne.s32.totalorder %s2130_s8, %s1689_s18  ;;  %s1693_s27 = sshll.u32 %s1784_s25, 4  ;;  %s1694_s27 = int_to_ptr.vmem [resolvable:$false] %s1693_s27 }
  0x64   : > { %1484 = vmatprep.subr.bf16.mxu1 %v1615_v9  ;;  %v335_v24 = vld [vmem:[%s1962_s30 + $0x10] sm:$0xff]  ;;  %v1629_v28 = vld [vmem:[#allocation6 + $0x38] sm:$0xff]   ;;  %v333_v29 = vld [vmem:[%s1962_s30] sm:$0xff]  ;;  %962 = vperm.xlu0 %1605, %v936_v32   ;;  %s1695_s12 = scalar_lea.vmem %s1694_s27, 6144  ;;  %p1696_p13 = scmp.lt.s32.totalorder %s2130_s8, %s1694_s27 }
  0x65   : > { %v353_v26 = vunpack.c.l.s8.bf16 %v335_v24  ;;  %635 = vmatprep.mubr.bf16.mxu0 %v352_v25  ;;  %v351_v30 = vunpack.c.l.s8.bf16 %v333_v29  ;;  %v338_v31 = vld [vmem:[%s1962_s30 + $0x28] sm:$0xff]  ;;  %v938_v33 = vld [vmem:[%s1984_s13 + $0x10] sm:$0xff]  ;;  %v356_v35 = vunpack.c.h.s8.bf16 %v335_v24  ;;  %v940_v40 = vld [vmem:[%s1984_s13 + $0x20] sm:$0xff]  ;;  %v354_v42 = vunpack.c.h.s8.bf16 %v333_v29  ;;  %p1691_p8 = pnand %p1690_p6, %p1904_p10  ;;  %p1697_p0 = scmp.lt.s32.totalorder %s1695_s12, %s1689_s18 }
  0x66   : > { %1377 = vmatpush3.bf16.msra.mxu0 %v1614_v8  ;;  %972 = vperm.xlu1 %1606, %v938_v33   ;;  %v359_v37 = vunpack.c.l.s8.bf16 %v338_v31  ;;  %v939_v38 = vld [vmem:[%s1984_s13 + $0x18] sm:$0xff]  ;;  %v337_v39 = vld [vmem:[%s1962_s30 + $0x20] sm:$0xff]  ;;  %v941_v41 = vld [vmem:[%s1984_s13 + $0x28] sm:$0xff]  ;;  %v362_v45 = vunpack.c.h.s8.bf16 %v338_v31 }
  0x67   : > { %1378 = vmatprep.subr.bf16.mxu0 %v1616_v10  ;;  %1485 = vmatpush3.bf16.msra.mxu1 %v1615_v9  ;;  %v341_v43 = vld [vmem:[%s1962_s30 + $0x40] sm:$0xff]  ;;  %v358_v44 = vunpack.c.l.s8.bf16 %v337_v39  ;;  %v943_v48 = vld [vmem:[%s1984_s13 + $0x38] sm:$0xff]  ;;  %v945_v51 = vld [vmem:[%s1984_s13 + $0x48] sm:$0xff]  ;;  %v361_v54 = vunpack.c.h.s8.bf16 %v337_v39  ;;  %p1692_p12 = pneg %p1691_p8  ;;  %p1698_p5 = por %p1697_p0, %p1696_p13 }
  0x68   : > { %1486 = vmatprep.subr.bf16.mxu1 %v1618_v12  ;;  %1496 = vmatprep.mubr.bf16.mxu1 %v353_v26  ;;  %v942_v46 = vld [vmem:[%s1984_s13 + $0x30] sm:$0xff]  ;;  %v365_v47 = vunpack.c.l.s8.bf16 %v341_v43  ;;  %v336_v49 = vld [vmem:[%s1962_s30 + $0x18] sm:$0xff]  ;;  %v944_v50 = vld [vmem:[%s1984_s13 + $0x40] sm:$0xff]  ;;  %v368_v55 = vunpack.c.h.s8.bf16 %v341_v43 }
  0x69   : > { %967 = vperm.xlu0 %1605, %v937_v36   ;;  %v357_v52 = vunpack.c.l.s8.bf16 %v336_v49  ;;  %v344_v53 = vld [vmem:[%s1962_s30 + $0x58] sm:$0xff]  ;;  %v946_v56 = vld [vmem:[%s1984_s13 + $0x50] sm:$0xff]  ;;  %v948_v60 = vld [vmem:[%s1984_s13 + $0x60] sm:$0xff]  ;;  %v360_v62 = vunpack.c.h.s8.bf16 %v336_v49  ;;  %p1699_p9 = pnand %p1698_p5, %p1692_p12 }
  0x6a   : > { %1379 = vmatpush3.bf16.msra.mxu0 %v1617_v11  ;;  %977 = vperm.xlu1 %1606, %v939_v38   ;;  %v371_v57 = vunpack.c.l.s8.bf16 %v344_v53  ;;  %v947_v58 = vld [vmem:[%s1984_s13 + $0x58] sm:$0xff]  ;;  %v949_v61 = vld [vmem:[%s1984_s13 + $0x68] sm:$0xff]  ;;  %v347_v63 = vld [vmem:[%s1962_s30 + $0x70] sm:$0xff]  ;;  %v374_v1 = vunpack.c.h.s8.bf16 %v344_v53 }
  0x6b   : > { %1380 = vmatprep.subr.bf16.mxu0 %v1619_v13  ;;  %1487 = vmatpush3.bf16.msra.mxu1 %v1618_v12  ;;  %v340_v59 = vld [vmem:[%s1962_s30 + $0x38] sm:$0xff]  ;;  %v950_v2 = vld [vmem:[%s1984_s13 + $0x70] sm:$0xff]  ;;  %v377_v3 = vunpack.c.l.s8.bf16 %v347_v63  ;;  %v952_v6 = vld [vmem:[%s1984_s13 + $0x80] sm:$0xff]  ;;  %v380_v11 = vunpack.c.h.s8.bf16 %v347_v63 }
  0x6c   : > { %1488 = vmatprep.subr.bf16.mxu1 %v1621_v14  ;;  %v364_v0 = vunpack.c.l.s8.bf16 %v340_v59  ;;  %v951_v4 = vld [vmem:[%s1984_s13 + $0x78] sm:$0xff]  ;;  %v339_v5 = vld [vmem:[%s1962_s30 + $0x30] sm:$0xff]  ;;  %v953_v7 = vld [vmem:[%s1984_s13 + $0x88] sm:$0xff]  ;;  %v367_v10 = vunpack.c.h.s8.bf16 %v340_v59 }
  0x6d   : > { %982 = vperm.xlu0 %1605, %v940_v40   ;;  %v363_v8 = vunpack.c.l.s8.bf16 %v339_v5  ;;  %v350_v9 = vld [vmem:[%s1962_s30 + $0x88] sm:$0xff]  ;;  %v954_v12 = vld [vmem:[%s1984_s13 + $0x90] sm:$0xff] }
  0x6e   : > { %1381 = vmatpush3.bf16.msra.mxu0 %v1620_v15  ;;  %987 = vperm.xlu1 %1606, %v941_v41   ;;  %v383_v13 = vunpack.c.l.s8.bf16 %v350_v9  ;;  %v343_v15 = vld [vmem:[%s1962_s30 + $0x50] sm:$0xff]  ;;  %v342_v23 = vld [vmem:[%s1962_s30 + $0x48] sm:$0xff]  ;;  %v345_v29 = vld [vmem:[%s1962_s30 + $0x60] sm:$0xff] }
  0x6f   : > { %1382 = vmatprep.subr.bf16.mxu0 %v1622_v16  ;;  %1489 = vmatpush3.bf16.msra.mxu1 %v1621_v14  ;;  %v955_v14 = vld [vmem:[%s1984_s13 + $0x98] sm:$0xff]  ;;  %v956_v16 = vld [vmem:[%s1984_s13 + $0xa0] sm:$0xff]  ;;  %v369_v24 = vunpack.c.l.s8.bf16 %v342_v23  ;;  %v373_v25 = vunpack.c.h.s8.bf16 %v343_v15  ;;  %v378_v33 = vunpack.c.h.s8.bf16 %v345_v29 }
  0x70   : > { %1490 = vmatprep.subr.bf16.mxu1 %v1624_v17  ;;  %v346_v26 = vld [vmem:[%s1962_s30 + $0x68] sm:$0xff]  ;;  %v349_v32 = vld [vmem:[%s1962_s30 + $0x80] sm:$0xff] }
  0x71   : > { %992 = vperm.xlu0 %1605, %v942_v46   ;;  %v379_v31 = vunpack.c.h.s8.bf16 %v346_v26 }
  0x72   : > { %1383 = vmatpush3.bf16.msra.mxu0 %v1623_v18  ;;  %997 = vperm.xlu1 %1606, %v943_v48   ;;  %v366_v18 = vunpack.c.h.s8.bf16 %v339_v5 }
  0x73   : > { %1384 = vmatprep.subr.bf16.mxu0 %v1625_v19  ;;  %1491 = vmatpush3.bf16.msra.mxu1 %v1624_v17  ;;  %v957_v17 = vld [vmem:[%s1984_s13 + $0xa8] sm:$0xff]  ;;  %v370_v19 = vunpack.c.l.s8.bf16 %v343_v15 }
  0x74   : > { %1492 = vmatprep.subr.bf16.mxu1 %v1627_v20 }
  0x75   : > { %1002 = vperm.xlu0 %1605, %v944_v50   ;;  %v1104_v50 = vld [vmem:[%s2030_s24] sm:$0xff] }
  0x76   : > { %1385 = vmatpush3.bf16.msra.mxu0 %v1626_v21  ;;  %1007 = vperm.xlu1 %1606, %v945_v51   ;;  %v958_v21 = vld [vmem:[%s1984_s13 + $0xb0] sm:$0xff] }
  0x77   : > { %1386 = vmatprep.subr.bf16.mxu0 %v1628_v22  ;;  %1493 = vmatpush3.bf16.msra.mxu1 %v1627_v20  ;;  %v386_v20 = vunpack.c.h.s8.bf16 %v350_v9  ;;  %v959_v22 = vld [vmem:[%s1984_s13 + $0xb8] sm:$0xff] }
  0x78   : > { %1494 = vmatprep.subr.bf16.mxu1 %v1630_v27 }
  0x79   : > { %1012 = vperm.xlu0 %1605, %v946_v56  }
  0x7a   : > { %1387 = vmatpush3.bf16.msra.mxu0 %v1629_v28  ;;  %1017 = vperm.xlu1 %1606, %v947_v58   ;;  %v376_v28 = vunpack.c.l.s8.bf16 %v346_v26 }
  0x7b   : > { %1495 = vmatpush3.bf16.msra.mxu1 %v1630_v27  ;;  %v372_v27 = vunpack.c.h.s8.bf16 %v342_v23 }
  0x7d   : > { %636 = vmatmul.mubr.bf16.vlgmr.msra.gmra.mrb[0].mxu0 %v351_v30  ;;  %1022 = vperm.xlu0 %1605, %v948_v60   ;;  %v375_v30 = vunpack.c.l.s8.bf16 %v345_v29 }
  0x7e   : > { %643 = vmatprep.mubr.bf16.mxu0 %v355_v34  ;;  %1497 = vmatmul.mubr.bf16.vlgmr.msra.gmra.mrb[0].mxu1 %v356_v35  ;;  %v382_v34 = vunpack.c.l.s8.bf16 %v349_v32  ;;  %v348_v35 = vld [vmem:[%s1962_s30 + $0x78] sm:$0xff]  ;;  %s2128_s30 = scalar_lea.hbm %s2185_s4, %s1371_s28 }
  0x7f   : > { %1500 = vmatprep.mubr.bf16.mxu1 %v359_v37  ;;  %1027 = vperm.xlu1 %1606, %v949_v61   ;;  %v381_v36 = vunpack.c.l.s8.bf16 %v348_v35  ;;  %v385_v37 = vunpack.c.h.s8.bf16 %v349_v32  ;;  %v384_v38 = vunpack.c.h.s8.bf16 %v348_v35  ;;  %v1109_v35 = vld [vmem:[%s2030_s24 + $0x28] sm:$0xff] }
  0x81   : > { %1032 = vperm.xlu0 %1605, %v950_v2  }
  0x83   : > { %1037 = vperm.xlu1 %1606, %v951_v4  }
  0x85   : > { %644 = vmatmul.mubr.bf16.gmra.mrb[4].mxu0 %v354_v42  ;;  %1042 = vperm.xlu0 %1605, %v952_v6  }
  0x86   : > { %651 = vmatprep.mubr.bf16.mxu0 %v358_v44  ;;  %1501 = vmatmul.mubr.bf16.gmra.mrb[4].mxu1 %v362_v45 }
  0x87   : > { %1504 = vmatprep.mubr.bf16.mxu1 %v365_v47  ;;  %1047 = vperm.xlu1 %1606, %v953_v7  }
  0x89   : > { %1052 = vperm.xlu0 %1605, %v954_v12  }
  0x8b   : > { %1057 = vperm.xlu1 %1606, %v955_v14  }
  0x8d   : > { %652 = vmatmul.mubr.bf16.gmra.mrb[8].mxu0 %v357_v52  ;;  %1062 = vperm.xlu0 %1605, %v956_v16  }
  0x8e   : > { %659 = vmatprep.mubr.bf16.mxu0 %v361_v54  ;;  %1505 = vmatmul.mubr.bf16.gmra.mrb[8].mxu1 %v368_v55  ;;  %v1105_v55 = vld [vmem:[%s2030_s24 + $0x8] sm:$0xff] }
  0x8f   : > { %1508 = vmatprep.mubr.bf16.mxu1 %v371_v57  ;;  %1067 = vperm.xlu1 %1606, %v957_v17  }
  0x91   : > { %1072 = vperm.xlu0 %1605, %v958_v21  }
  0x93   : > { %1077 = vperm.xlu1 %1606, %v959_v22  }
  0x95   : > { %660 = vmatmul.mubr.bf16.gmra.mrb[12].mxu0 %v360_v62 }
  0x96   : > { %667 = vmatprep.mubr.bf16.mxu0 %v364_v0  ;;  %1509 = vmatmul.mubr.bf16.gmra.mrb[12].mxu1 %v374_v1 }
  0x97   : > { %1512 = vmatprep.mubr.bf16.mxu1 %v377_v3 }
  0x9d   : > { %668 = vmatmul.mubr.bf16.gmra.mrb[16].mxu0 %v363_v8  ;;  %v1106_v8 = vld [vmem:[%s2030_s24 + $0x10] sm:$0xff] }
  0x9e   : > { %675 = vmatprep.mubr.bf16.mxu0 %v367_v10  ;;  %1513 = vmatmul.mubr.bf16.gmra.mrb[16].mxu1 %v380_v11 }
  0x9f   : > { %1516 = vmatprep.mubr.bf16.mxu1 %v383_v13  ;;  %v1107_v13 = vld [vmem:[%s2030_s24 + $0x18] sm:$0xff] }
  0xa5   : > { %676 = vmatmul.mubr.bf16.gmra.mrb[20].mxu0 %v366_v18 }
  0xa6   : > { %683 = vmatprep.mubr.bf16.mxu0 %v370_v19  ;;  %1517 = vmatmul.mubr.bf16.gmra.mrb[20].mxu1 %v386_v20 }
  0xad   : > { %684 = vmatmul.mubr.bf16.gmra.mrb[24].mxu0 %v369_v24 }
  0xae   : > { %691 = vmatprep.mubr.bf16.mxu0 %v373_v25 }
  0xb5   : > { %692 = vmatmul.mubr.bf16.gmra.mrb[28].mxu0 %v372_v27 }
  0xb6   : > { %699 = vmatprep.mubr.bf16.mxu0 %v376_v28 }
  0xbd   : > { %700 = vmatmul.mubr.bf16.gmra.mrb[32].mxu0 %v375_v30  ;;  %v1108_v30 = vld [vmem:[%s2030_s24 + $0x20] sm:$0xff] }
  0xbe   : > { %707 = vmatprep.mubr.bf16.mxu0 %v379_v31 }
  0xc5   : > { %708 = vmatmul.mubr.bf16.gmra.mrb[36].mxu0 %v378_v33 }
  0xc6   : > { %715 = vmatprep.mubr.bf16.mxu0 %v382_v34 }
  0xcd   : > { %716 = vmatmul.mubr.bf16.gmra.mrb[40].mxu0 %v381_v36 }
  0xce   : > { %723 = vmatprep.mubr.bf16.mxu0 %v385_v37 }
  0xd5   : > { %724 = vmatmul.mubr.bf16.gmra.mrb[44].mxu0 %v384_v38 }
  0xe3   : > { %v963_v39 = vpop.permute.xlu0 %962 }
  0xe5   : > { %v973_v59 = vpop.permute.xlu1 %972 }
  0xe8   : > { %v968_v52 = vpop.permute.xlu0 %967 }
  0xe9   : > { %v978_v12 = vpop.permute.xlu1 %977 }
  0xec   : > { %v983_v29 = vpop.permute.xlu0 %982 }
  0xed   : > { %v988_v34 = vpop.permute.xlu1 %987 }
 0x150   : > { %v1388_v40 = vpop.f32.mrb[0].mxu0 }
 0x151   : > { %v1389_v41 = vpop.f32.mrb[1].mxu0  ;;  %v1498_v44 = vpop.f32.mrb[0].mxu1 }
 0x152   : > { %v1390_v42 = vadd.f32 %v1389_v41, %v1388_v40  ;;  %v1391_v43 = vpop.f32.mrb[2].mxu0  ;;  %v766_v46 = vpop.f32.mrb[1].mxu1 }
 0x153   : > { %v1392_v45 = vpop.f32.mrb[3].mxu0  ;;  %v1499_v49 = vpop.f32.mrb[2].mxu1 }
 0x154   : > { %v1393_v47 = vadd.f32 %v1392_v45, %v1391_v43  ;;  %v767_v48 = vadd.f32 %v1390_v42, %v766_v46  ;;  %v769_v51 = vpop.f32.mrb[3].mxu1 }
 0x156   : > { %v1080_v53 = vmul.f32 %v963_v39, %v767_v48  ;;  %v770_v54 = vadd.f32 %v1393_v47, %v769_v51  ;;  %v993_v51 = vpop.permute.xlu0 %992 }
 0x158   : > { %v1128_v56 = vadd.f32 %v1104_v50, %v1080_v53  ;;  %v1081_v57 = vmul.f32 %v968_v52, %v770_v54  ;;  %v1394_v58 = vpop.f32.mrb[4].mxu0  ;;  %v1110_v52 = vld [vmem:[%s2030_s24 + $0x30] sm:$0xff] }
 0x159   : > { %v1395_v60 = vpop.f32.mrb[5].mxu0  ;;  %v1502_v1 = vpop.f32.mrb[4].mxu1 }
 0x15a   : > { %v1152_v61 = vmax.f32 %v1128_v56, 0.0  ;;  %v1129_v62 = vadd.f32 %v1105_v55, %v1081_v57  ;;  %v1396_v63 = vadd.f32 %v1395_v60, %v1394_v58  ;;  %v1397_v0 = vpop.f32.mrb[6].mxu0  ;;  %v782_v3 = vpop.f32.mrb[5].mxu1  ;;  %v1111_v57 = vld [vmem:[%s2030_s24 + $0x38] sm:$0xff] }
 0x15b   : > { %v1398_v2 = vpop.f32.mrb[7].mxu0  ;;  %v1503_v7 = vpop.f32.mrb[6].mxu1 }
 0x15c   : > { %1176 = vst [vmem:[%s2035_s6] sm:$0xff] %v1152_v61  ;;  %v1153_v4 = vmax.f32 %v1129_v62, 0.0  ;;  %v775_v5 = vadd.f32 %v1498_v44, %v1396_v63  ;;  %v1399_v6 = vadd.f32 %v1398_v2, %v1397_v0  ;;  %v785_v9 = vpop.f32.mrb[7].mxu1  ;;  %v998_v56 = vpop.permute.xlu1 %997 }
 0x15e   : > { %1177 = vst [vmem:[%s2035_s6 + $0x8] sm:$0xff] %v1153_v4  ;;  %v1082_v10 = vmul.f32 %v973_v59, %v775_v5  ;;  %v778_v11 = vadd.f32 %v1499_v49, %v1399_v6 }
 0x160   : > { %v1130_v14 = vadd.f32 %v1106_v8, %v1082_v10  ;;  %v1083_v15 = vmul.f32 %v978_v12, %v778_v11  ;;  %v1400_v16 = vpop.f32.mrb[8].mxu0  ;;  %v1112_v10 = vld [vmem:[%s2030_s24 + $0x40] sm:$0xff] }
 0x161   : > { %v1401_v17 = vpop.f32.mrb[9].mxu0  ;;  %v2041_v22 = vpop.f32.mrb[8].mxu1 }
 0x162   : > { %v1154_v18 = vmax.f32 %v1130_v14, 0.0  ;;  %v1131_v19 = vadd.f32 %v1107_v13, %v1083_v15  ;;  %v1402_v20 = vadd.f32 %v1401_v17, %v1400_v16  ;;  %v1403_v21 = vpop.f32.mrb[10].mxu0  ;;  %v798_v24 = vpop.f32.mrb[9].mxu1  ;;  %v1113_v15 = vld [vmem:[%s2030_s24 + $0x48] sm:$0xff] }
 0x163   : > { %v1404_v23 = vpop.f32.mrb[11].mxu0  ;;  %v2044_v28 = vpop.f32.mrb[10].mxu1 }
 0x164   : > { %1178 = vst [vmem:[%s2035_s6 + $0x10] sm:$0xff] %v1154_v18  ;;  %v1155_v25 = vmax.f32 %v1131_v19, 0.0  ;;  %v1405_v26 = vadd.f32 %v1404_v23, %v1403_v21  ;;  %v783_v27 = vadd.f32 %v1402_v20, %v782_v3  ;;  %v801_v31 = vpop.f32.mrb[11].mxu1  ;;  %v1008_v14 = vpop.permute.xlu1 %1007 }
 0x166   : > { %1179 = vst [vmem:[%s2035_s6 + $0x18] sm:$0xff] %v1155_v25  ;;  %v1084_v32 = vmul.f32 %v983_v29, %v783_v27  ;;  %v786_v33 = vadd.f32 %v1405_v26, %v785_v9  ;;  %v1003_v9 = vpop.permute.xlu0 %1002 }
 0x168   : > { %v1132_v36 = vadd.f32 %v1108_v30, %v1084_v32  ;;  %v1085_v37 = vmul.f32 %v988_v34, %v786_v33  ;;  %v1406_v38 = vpop.f32.mrb[12].mxu0  ;;  %v1114_v34 = vld [vmem:[%s2030_s24 + $0x50] sm:$0xff] }
 0x169   : > { %v1407_v39 = vpop.f32.mrb[13].mxu0  ;;  %v2049_v44 = vpop.f32.mrb[12].mxu1 }
 0x16a   : > { %v1156_v40 = vmax.f32 %v1132_v36, 0.0  ;;  %v1133_v41 = vadd.f32 %v1109_v35, %v1085_v37  ;;  %v1408_v42 = vadd.f32 %v1407_v39, %v1406_v38  ;;  %v1409_v43 = vpop.f32.mrb[14].mxu0  ;;  %v2051_v46 = vpop.f32.mrb[13].mxu1  ;;  %v1115_v39 = vld [vmem:[%s2030_s24 + $0x58] sm:$0xff] }
 0x16b   : > { %v1410_v45 = vpop.f32.mrb[15].mxu0  ;;  %v2054_v50 = vpop.f32.mrb[14].mxu1 }
 0x16c   : > { %1180 = vst [vmem:[%s2035_s6 + $0x20] sm:$0xff] %v1156_v40  ;;  %v1157_v47 = vmax.f32 %v1133_v41, 0.0  ;;  %v791_v48 = vadd.f32 %v1502_v1, %v1408_v42  ;;  %v1411_v49 = vadd.f32 %v1410_v45, %v1409_v43  ;;  %v2057_v53 = vpop.f32.mrb[15].mxu1  ;;  %v1013_v33 = vpop.permute.xlu0 %1012 }
 0x16d   : > { %v1018_v38 = vpop.permute.xlu1 %1017 }
 0x16e   : > { %1181 = vst [vmem:[%s2035_s6 + $0x28] sm:$0xff] %v1157_v47  ;;  %v1086_v54 = vmul.f32 %v993_v51, %v791_v48  ;;  %v794_v55 = vadd.f32 %v1503_v7, %v1411_v49 }
 0x170   : > { %v1134_v58 = vadd.f32 %v1110_v52, %v1086_v54  ;;  %v1087_v59 = vmul.f32 %v998_v56, %v794_v55  ;;  %v1412_v60 = vpop.f32.mrb[16].mxu0  ;;  %v1116_v55 = vld [vmem:[%s2030_s24 + $0x60] sm:$0xff] }
 0x171   : > { %v1413_v61 = vpop.f32.mrb[17].mxu0  ;;  %v2061_v2 = vpop.f32.mrb[16].mxu1 }
 0x172   : > { %v1158_v62 = vmax.f32 %v1134_v58, 0.0  ;;  %v1135_v63 = vadd.f32 %v1111_v57, %v1087_v59  ;;  %v1414_v0 = vadd.f32 %v1413_v61, %v1412_v60  ;;  %v1415_v1 = vpop.f32.mrb[18].mxu0  ;;  %v2063_v4 = vpop.f32.mrb[17].mxu1  ;;  %v1117_v59 = vld [vmem:[%s2030_s24 + $0x68] sm:$0xff] }
 0x173   : > { %v1416_v3 = vpop.f32.mrb[19].mxu0  ;;  %v2066_v8 = vpop.f32.mrb[18].mxu1 }
 0x174   : > { %1182 = vst [vmem:[%s2035_s6 + $0x30] sm:$0xff] %v1158_v62  ;;  %v1159_v5 = vmax.f32 %v1135_v63, 0.0  ;;  %v1417_v6 = vadd.f32 %v1416_v3, %v1415_v1  ;;  %v799_v7 = vadd.f32 %v1414_v0, %v798_v24  ;;  %v2069_v11 = vpop.f32.mrb[19].mxu1  ;;  %v1028_v58 = vpop.permute.xlu1 %1027 }
 0x176   : > { %1183 = vst [vmem:[%s2035_s6 + $0x38] sm:$0xff] %v1159_v5  ;;  %v1088_v12 = vmul.f32 %v1003_v9, %v799_v7  ;;  %v802_v13 = vadd.f32 %v1417_v6, %v801_v31 }
 0x178   : > { %v1136_v16 = vadd.f32 %v1112_v10, %v1088_v12  ;;  %v1089_v17 = vmul.f32 %v1008_v14, %v802_v13  ;;  %v1418_v18 = vpop.f32.mrb[20].mxu0  ;;  %v1118_v10 = vld [vmem:[%s2030_s24 + $0x70] sm:$0xff]  ;;  %v1038_v14 = vpop.permute.xlu1 %1037 }
 0x179   : > { %v1419_v19 = vpop.f32.mrb[21].mxu0  ;;  %v2073_v25 = vpop.f32.mrb[20].mxu1 }
 0x17a   : > { %v1160_v20 = vmax.f32 %v1136_v16, 0.0  ;;  %v1137_v21 = vadd.f32 %v1113_v15, %v1089_v17  ;;  %v1420_v23 = vadd.f32 %v1419_v19, %v1418_v18  ;;  %v1421_v24 = vpop.f32.mrb[22].mxu0  ;;  %v2075_v27 = vpop.f32.mrb[21].mxu1  ;;  %v1119_v15 = vld [vmem:[%s2030_s24 + $0x78] sm:$0xff] }
 0x17b   : > { %v1422_v26 = vpop.f32.mrb[23].mxu0  ;;  %v2079_v32 = vpop.f32.mrb[22].mxu1 }
 0x17c   : > { %1184 = vst [vmem:[%s2035_s6 + $0x40] sm:$0xff] %v1160_v20  ;;  %v1161_v29 = vmax.f32 %v1137_v21, 0.0  ;;  %v807_v30 = vadd.f32 %v2041_v22, %v1420_v23  ;;  %v1423_v31 = vadd.f32 %v1422_v26, %v1421_v24  ;;  %v2082_v35 = vpop.f32.mrb[23].mxu1 }
 0x17e   : > { %1185 = vst [vmem:[%s2035_s6 + $0x48] sm:$0xff] %v1161_v29  ;;  %v1090_v36 = vmul.f32 %v1013_v33, %v807_v30  ;;  %v810_v37 = vadd.f32 %v2044_v28, %v1423_v31  ;;  %v1023_v28 = vpop.permute.xlu0 %1022  ;;  %v1120_v31 = vld [vmem:[%s2030_s24 + $0x80] sm:$0xff] }
 0x180   : > { %v1138_v40 = vadd.f32 %v1114_v34, %v1090_v36  ;;  %v1091_v41 = vmul.f32 %v1018_v38, %v810_v37  ;;  %v1424_v42 = vpop.f32.mrb[24].mxu0  ;;  %v1048_v36 = vpop.permute.xlu1 %1047  ;;  %v1121_v37 = vld [vmem:[%s2030_s24 + $0x88] sm:$0xff] }
 0x181   : > { %v1425_v22 = vpop.f32.mrb[25].mxu0 }
 0x182   : > { %v1162_v43 = vmax.f32 %v1138_v40, 0.0  ;;  %v1139_v45 = vadd.f32 %v1115_v39, %v1091_v41  ;;  %v1426_v47 = vadd.f32 %v1425_v22, %v1424_v42  ;;  %v1427_v48 = vpop.f32.mrb[26].mxu0 }
 0x183   : > { %v1428_v49 = vpop.f32.mrb[27].mxu0 }
 0x184   : > { %1186 = vst [vmem:[%s2035_s6 + $0x50] sm:$0xff] %v1162_v43  ;;  %v1163_v51 = vmax.f32 %v1139_v45, 0.0  ;;  %v1429_v52 = vadd.f32 %v1428_v49, %v1427_v48  ;;  %v815_v54 = vadd.f32 %v1426_v47, %v2051_v46 }
 0x186   : > { %1187 = vst [vmem:[%s2035_s6 + $0x58] sm:$0xff] %v1163_v51  ;;  %v1092_v56 = vmul.f32 %v1023_v28, %v815_v54  ;;  %v818_v57 = vadd.f32 %v1429_v52, %v2057_v53  ;;  %v1033_v53 = vpop.permute.xlu0 %1032  ;;  %v1122_v51 = vld [vmem:[%s2030_s24 + $0x90] sm:$0xff]  ;;  %v1058_v28 = vpop.permute.xlu1 %1057 }
 0x188   : > { %v1140_v60 = vadd.f32 %v1116_v55, %v1092_v56  ;;  %v1093_v61 = vmul.f32 %v1028_v58, %v818_v57  ;;  %v1430_v62 = vpop.f32.mrb[28].mxu0  ;;  %v1123_v55 = vld [vmem:[%s2030_s24 + $0x98] sm:$0xff] }
 0x189   : > { %v1431_v63 = vpop.f32.mrb[29].mxu0 }
 0x18a   : > { %v1164_v0 = vmax.f32 %v1140_v60, 0.0  ;;  %v1141_v1 = vadd.f32 %v1117_v59, %v1093_v61  ;;  %v1432_v3 = vadd.f32 %v1431_v63, %v1430_v62  ;;  %v1433_v46 = vpop.f32.mrb[30].mxu0 }
 0x18b   : > { %v1434_v5 = vpop.f32.mrb[31].mxu0 }
 0x18c   : > { %1188 = vst [vmem:[%s2035_s6 + $0x60] sm:$0xff] %v1164_v0  ;;  %v1165_v6 = vmax.f32 %v1141_v1, 0.0  ;;  %v823_v7 = vadd.f32 %v2049_v44, %v1432_v3  ;;  %v1435_v9 = vadd.f32 %v1434_v5, %v1433_v46  ;;  %v1124_v46 = vld [vmem:[%s2030_s24 + $0xa0] sm:$0xff] }
 0x18e   : > { %1189 = vst [vmem:[%s2035_s6 + $0x68] sm:$0xff] %v1165_v6  ;;  %v1094_v12 = vmul.f32 %v1033_v53, %v823_v7  ;;  %v826_v13 = vadd.f32 %v2054_v50, %v1435_v9  ;;  %v1043_v50 = vpop.permute.xlu0 %1042  ;;  %v1068_v7 = vpop.permute.xlu1 %1067  ;;  %v1125_v9 = vld [vmem:[%s2030_s24 + $0xa8] sm:$0xff] }
 0x190   : > { %v1142_v16 = vadd.f32 %v1118_v10, %v1094_v12  ;;  %v1095_v17 = vmul.f32 %v1038_v14, %v826_v13  ;;  %v1436_v18 = vpop.f32.mrb[32].mxu0 }
 0x191   : > { %v1437_v19 = vpop.f32.mrb[33].mxu0 }
 0x192   : > { %v1166_v20 = vmax.f32 %v1142_v16, 0.0  ;;  %v1143_v21 = vadd.f32 %v1119_v15, %v1095_v17  ;;  %v1438_v44 = vadd.f32 %v1437_v19, %v1436_v18  ;;  %v1439_v23 = vpop.f32.mrb[34].mxu0 }
 0x193   : > { %v1440_v24 = vpop.f32.mrb[35].mxu0 }
 0x194   : > { %1190 = vst [vmem:[%s2035_s6 + $0x70] sm:$0xff] %v1166_v20  ;;  %v1167_v26 = vmax.f32 %v1143_v21, 0.0  ;;  %v1441_v29 = vadd.f32 %v1440_v24, %v1439_v23  ;;  %v831_v30 = vadd.f32 %v1438_v44, %v2063_v4  ;;  %v1126_v21 = vld [vmem:[%s2030_s24 + $0xb0] sm:$0xff]  ;;  %v1078_v24 = vpop.permute.xlu1 %1077 }
 0x196   : > { %1191 = vst [vmem:[%s2035_s6 + $0x78] sm:$0xff] %v1167_v26  ;;  %v1096_v33 = vmul.f32 %v1043_v50, %v831_v30  ;;  %v834_v34 = vadd.f32 %v1441_v29, %v2069_v11  ;;  %v1053_v11 = vpop.permute.xlu0 %1052  ;;  %v1127_v26 = vld [vmem:[%s2030_s24 + $0xb8] sm:$0xff] }
 0x198   : > { %v1144_v38 = vadd.f32 %v1120_v31, %v1096_v33  ;;  %v1097_v39 = vmul.f32 %v1048_v36, %v834_v34  ;;  %v1442_v40 = vpop.f32.mrb[36].mxu0 }
 0x199   : > { %v1443_v41 = vpop.f32.mrb[37].mxu0 }
 0x19a   : > { %v1168_v42 = vmax.f32 %v1144_v38, 0.0  ;;  %v1145_v22 = vadd.f32 %v1121_v37, %v1097_v39  ;;  %v1444_v43 = vadd.f32 %v1443_v41, %v1442_v40  ;;  %v1445_v4 = vpop.f32.mrb[38].mxu0 }
 0x19b   : > { %v1446_v45 = vpop.f32.mrb[39].mxu0 }
 0x19c   : > { %1192 = vst [vmem:[%s2035_s6 + $0x80] sm:$0xff] %v1168_v42  ;;  %v1169_v47 = vmax.f32 %v1145_v22, 0.0  ;;  %v839_v48 = vadd.f32 %v2061_v2, %v1444_v43  ;;  %v1447_v49 = vadd.f32 %v1446_v45, %v1445_v4 }
 0x19e   : > { %1193 = vst [vmem:[%s2035_s6 + $0x88] sm:$0xff] %v1169_v47  ;;  %v1098_v52 = vmul.f32 %v1053_v11, %v839_v48  ;;  %v842_v54 = vadd.f32 %v2066_v8, %v1447_v49  ;;  %v1063_v8 = vpop.permute.xlu0 %1062 }
 0x1a0   : > { %v1146_v56 = vadd.f32 %v1122_v51, %v1098_v52  ;;  %v1099_v57 = vmul.f32 %v1058_v28, %v842_v54  ;;  %v1448_v58 = vpop.f32.mrb[40].mxu0 }
 0x1a1   : > { %v1449_v59 = vpop.f32.mrb[41].mxu0 }
 0x1a2   : > { %v1170_v60 = vmax.f32 %v1146_v56, 0.0  ;;  %v1147_v61 = vadd.f32 %v1123_v55, %v1099_v57  ;;  %v1450_v2 = vadd.f32 %v1449_v59, %v1448_v58  ;;  %v1451_v62 = vpop.f32.mrb[42].mxu0  ;;  %v1073_v20 = vpop.permute.xlu0 %1072 }
 0x1a3   : > { %v1452_v63 = vpop.f32.mrb[43].mxu0 }
 0x1a4   : > { %1194 = vst [vmem:[%s2035_s6 + $0x90] sm:$0xff] %v1170_v60  ;;  %v1171_v0 = vmax.f32 %v1147_v61, 0.0  ;;  %v1453_v1 = vadd.f32 %v1452_v63, %v1451_v62  ;;  %v847_v3 = vadd.f32 %v1450_v2, %v2075_v27 }
 0x1a6   : > { %1195 = vst [vmem:[%s2035_s6 + $0x98] sm:$0xff] %v1171_v0  ;;  %v1100_v5 = vmul.f32 %v1063_v8, %v847_v3  ;;  %v850_v6 = vadd.f32 %v1453_v1, %v2082_v35 }
 0x1a8   : > { %v1148_v53 = vadd.f32 %v1124_v46, %v1100_v5  ;;  %v1101_v10 = vmul.f32 %v1068_v7, %v850_v6  ;;  %v1454_v12 = vpop.f32.mrb[44].mxu0 }
 0x1a9   : > { %v1455_v13 = vpop.f32.mrb[45].mxu0 }
 0x1aa   : > { %v1172_v14 = vmax.f32 %v1148_v53, 0.0  ;;  %v1149_v15 = vadd.f32 %v1125_v9, %v1101_v10  ;;  %v1456_v27 = vadd.f32 %v1455_v13, %v1454_v12  ;;  %v1457_v16 = vpop.f32.mrb[46].mxu0 }
 0x1ab   : > { %v1458_v17 = vpop.f32.mrb[47].mxu0 }
 0x1ac   : > { %1196 = vst [vmem:[%s2035_s6 + $0xa0] sm:$0xff] %v1172_v14  ;;  %v1173_v18 = vmax.f32 %v1149_v15, 0.0  ;;  %v855_v35 = vadd.f32 %v2073_v25, %v1456_v27  ;;  %v1459_v19 = vadd.f32 %v1458_v17, %v1457_v16 }
 0x1ae   : > { %1197 = vst [vmem:[%s2035_s6 + $0xa8] sm:$0xff] %v1173_v18  ;;  %v1102_v44 = vmul.f32 %v1073_v20, %v855_v35  ;;  %v858_v23 = vadd.f32 %v2079_v32, %v1459_v19 }
 0x1b0   : > { %v1150_v29 = vadd.f32 %v1126_v21, %v1102_v44  ;;  %v1103_v30 = vmul.f32 %v1078_v24, %v858_v23 }
 0x1b2   : > { %v1174_v50 = vmax.f32 %v1150_v29, 0.0  ;;  %v1151_v31 = vadd.f32 %v1127_v26, %v1103_v30 }
 0x1b4   : > { %1198 = vst [vmem:[%s2035_s6 + $0xb0] sm:$0xff] %v1174_v50  ;;  %v1175_v25 = vmax.f32 %v1151_v31, 0.0 }
 0x1b6   : > { %1199 = vst [vmem:[%s2035_s6 + $0xb8] sm:$0xff] %v1175_v25 }
 0x1b7   : > { %1702 = shalt.err (!%p1699_p9)
}
 0x1b8   : > { %s1703_s13 = scalar_lea.hbm %s2128_s30, 3072  ;;  %s1707_s24 = scalar_lea.hbm %s2185_s4, 6144 }
 0x1b9   : > { %p1704_p1 = scmp.ne.s32.totalorder %s2128_s30, %s1703_s13  ;;  %p1708_p7 = scmp.lt.u32.totalorder %s2128_s30, %s2185_s4 }
 0x1ba   : > { %p1709_p11 = scmp.lt.u32.totalorder %s1707_s24, %s1703_s13  ;;  %p1711_p6 = scmp.lt.u32.totalorder %s1703_s13, %s2128_s30 }
 0x1bb   : > { %p1705_p2 = pnand %p1704_p1, %p1904_p10 }
 0x1bc   : > { %p1710_p4 = por %p1709_p11, %p1708_p7 }
 0x1bd   : > { %p1706_p3 = pneg %p1705_p2 }
 0x1be   : > { %p1712_p8 = por %p1711_p6, %p1710_p4 }
 0x1c0   : > { %p1713_p12 = pnand %p1712_p8, %p1706_p3 }
 0x1c2   : > { %1716 = shalt.err (!%p1713_p12)
}
 0x1c3   : > { %s1785_s28 = smov 128   ;;  %s1786_s29 = smov 8  }
 0x1c4   : > { %1530 = dma.vmem_to_hbm [thread:$0]  (%p1904_p10), %s2130_s8, 3072, %s2128_s30, %s1201_s23, %s1785_s28, %s1785_s28, %s1786_s29  }
 0x1c5 PF: > { %s1229_s11 = sand.u32 1, %s1755_s15   ;;  %p2202_p13 = scmp.ne.s32.totalorder %s2193_s26, 0 }
 0x1c6   : > { %p2203_p0 = scmp.ge.s32.totalorder %s1775_s20, 2  ;;  %s1230_s18 = scalar_lea.sflag [#allocation5], %s1229_s11 }
 0x1c8   : > { %p1541_p5 = pnand %p2203_p0, %p2202_p13 }
 0x1ca   : > { %1750 = dma.done.wait (!%p1541_p5), %s1230_s18, 3072  }
 0x1cb   : > { %1752 = vsyncadd (!%p1541_p5), %s1230_s18, 4294964224  ;;  %s21_s20 = sadd.s32 1, %s1775_s20   ;;  %s2204_s15 = smov %s1759_s16 }
 0x1cc   : > { %p18_p9 = scmp.ge.s32.totalorder %s21_s20, 4   ;;  %s2205_s16 = smov %s1763_s17 }
 0x1cd   : > { %s2206_s17 = smov %s1913_s10  ;;  %s2207_s18 = smov %s1771_s19 }
 0x1ce   : > { %s2208_s19 = smov %s2210_s5  ;;  %20 = sbr.rel (!%p18_p9) target bundleno = 7 (0x7), region = 100 }
 0x1d5   :  { %1235 = vsyncpa [#allocation4], 1 }
 0x1d6   :  { %1237 = vsyncpa [#allocation4 + $0x1], 1 }
 0x1d7   :  { %1238 = vsyncpa [#allocation7], 1 }
 0x1d8   :  { %1239 = vsyncpa [#allocation5], 1 }
 0x1d9   :  { %1241 = vsyncpa [#allocation5 + $0x1], 1 }

</bundles_post_ra>
